<compile_context>
chip_gen: v7x
topology: tpu7x:2x2x1
jax: 0.10.0
libtpu: 0.0.40
codegen_flags: <defaults>
</compile_context>

<pallas_src>
import functools

import jax
import jax.numpy as jnp
from jax.experimental import pallas as pl
from jax.experimental.pallas import tpu as pltpu


def _round_up(x, m):
    return ((x + m - 1) // m) * m


def _cdiv(a, b):
    return (a + b - 1) // b


def _tf_meta_ae_kernel(x_ref, we_ref, wi_ref, wd_ref, out_ref):
    # x_ref:  [TN, Gp]  f32 row tile of the (possibly padded) input (pipelined)
    # we_ref: [Gp, Kp]  masked encoder weight, transposed (whole-array VMEM resident)
    # wi_ref: [Kp, Kp]  intermediate weight, transposed   (whole-array VMEM resident)
    # wd_ref: [Kp, Gp]  decoder weight, transposed        (whole-array VMEM resident)
    # out_ref:[TN, Gp]  output row tile (pipelined)
    cdt = we_ref.dtype

    # In-kernel bf16 cast (VPU work hidden under DMA/MXU) instead of a
    # wrapper-side cast that would materialize a second copy of x in HBM.
    x = x_ref[...].astype(cdt)

    # encoder: Linear(G -> K, bias=False) + ReLU (f32 MXU accumulation).
    h = jnp.dot(x, we_ref[...], preferred_element_type=jnp.float32)
    h = jnp.maximum(h, 0.0)

    # _intermediate: Linear(K -> K, bias=False) + ReLU.
    z = jnp.dot(h.astype(cdt), wi_ref[...], preferred_element_type=jnp.float32)
    z = jnp.maximum(z, 0.0)

    # _decoder: Linear(K -> G, bias=False) + ReLU (output_activation='relu').
    y = jnp.dot(z.astype(cdt), wd_ref[...], preferred_element_type=jnp.float32)
    y = jnp.maximum(y, 0.0)

    out_ref[...] = y.astype(out_ref.dtype)


def prepare_weights(w_enc, prior_mask, w_int, w_dec, compute_dtype=jnp.bfloat16):
    """One-time weight preparation (call at model setup, NOT per forward).

    Folds the prior-network mask into the encoder weight, transposes all
    weights into x @ W form, zero-pads K and G to multiples of 128 for
    lane-dense MXU tiles, and casts to the compute dtype (bf16 by default).

    w_enc:      [K, G]  encoder Linear weight (PyTorch out_features x in_features)
    prior_mask: [G, K]  prior network mask (genes x TFs), nonzero = connection
    w_int:      [K, K]  intermediate Linear weight
    w_dec:      [G, K]  decoder Linear weight
    """
    K, G = w_enc.shape
    Kp = _round_up(K, 128)
    Gp = _round_up(G, 128)

    we_t = (w_enc * prior_mask.T).T            # [G, K]
    wi_t = w_int.T                             # [K, K]
    wd_t = w_dec.T                             # [K, G]

    we_t = jnp.pad(we_t, ((0, Gp - G), (0, Kp - K))).astype(compute_dtype)
    wi_t = jnp.pad(wi_t, ((0, Kp - K), (0, Kp - K))).astype(compute_dtype)
    wd_t = jnp.pad(wd_t, ((0, Kp - K), (0, Gp - G))).astype(compute_dtype)
    return we_t, wi_t, wd_t


def _vmem_capacity_bytes(default=64 * 1024 * 1024):
    """Per-core VMEM capacity; conservative 64 MiB (v7x per-TC) fallback."""
    try:
        return int(pltpu.get_tpu_info().vmem_capacity_bytes)
    except Exception:
        return default


def _choose_tn(n_rows, gp, kp, tn_req, x_isz, out_isz, w_isz, vmem_budget):
    """Pick a 16-aligned row tile that (a) keeps >= 2 grid steps when the
    batch allows it (v7x megacore sharding) and (b) fits the VMEM budget with
    single-buffered weights + double-buffered x/out tiles + f32 temporaries."""
    tn = max(16, min(_round_up(tn_req, 16), _round_up(n_rows, 16)))
    if n_rows > 16 and _cdiv(n_rows, tn) < 2:
        tn = max(16, _round_up(_cdiv(n_rows, 2), 16))

    wbytes = (gp * kp + kp * kp + kp * gp) * w_isz          # resident, 1 copy

    def working_set(t):
        tiles = 2 * t * gp * (x_isz + out_isz)               # double-buffered x/out
        temps = t * (2 * kp + gp) * 4 + 2 * t * kp * w_isz   # f32 h/z/y + bf16 casts
        return int(1.25 * (wbytes + tiles + temps))          # 25% headroom

    while tn > 16 and working_set(tn) > vmem_budget:
        tn = max(16, _round_up(tn // 2, 16))
    return tn, working_set(tn)


@functools.partial(jax.jit, static_argnames=("tn", "out_dtype"))
def tf_meta_autoencoder_forward(x, we_t, wi_t, wd_t, *, tn=256, out_dtype=None):
    """Pallas forward for TFMetaAutoencoder (inference path).

    x:                 [N, G]  gene expression (f32)
    we_t, wi_t, wd_t:  outputs of prepare_weights() (padded, transposed, bf16)
    returns:           [N, G]  reconstruction in out_dtype (default x.dtype)
    """
    N, G = x.shape
    Gp, Kp = we_t.shape
    out_dtype = x.dtype if out_dtype is None else out_dtype

    x_isz = jnp.dtype(x.dtype).itemsize
    o_isz = jnp.dtype(out_dtype).itemsize
    w_isz = jnp.dtype(we_t.dtype).itemsize

    capacity = _vmem_capacity_bytes()
    budget = int(0.8 * capacity)
    tn, need = _choose_tn(N, Gp, Kp, tn, x_isz, o_isz, w_isz, budget)
    # TODO(synk): for gene-scale G where the resident weight slabs alone exceed
    # the per-core VMEM budget (v7x, 64 MiB/TC), add an inner "arbitrary" grid
    # axis over decoder-output tiles with h/z persisted in VMEM scratch; int8
    # (v5e/v6e) or fp8 (v7x) weight quantization is a further option.

    Np = _round_up(N, tn)
    pad_rows = Np - N
    pad_cols = Gp - G

    # Pad only when strictly needed; keep x in its original dtype so the kernel
    # reads it straight from HBM without an extra cast pass.
    x_in = x
    if pad_rows or pad_cols:
        x_in = jnp.pad(x, ((0, pad_rows), (0, pad_cols)))

    vmem_limit = int(min(capacity, max(need, 32 * 1024 * 1024)))

    y_p = pl.pallas_call(
        _tf_meta_ae_kernel,
        out_shape=jax.ShapeDtypeStruct((Np, Gp), out_dtype),
        grid=(Np // tn,),
        in_specs=[
            pl.BlockSpec((tn, Gp), lambda i: (i, 0)),         # x row tile (pipelined)
            # Whole-array, single-buffered VMEM residency for the weights.
            pl.BlockSpec(memory_space=pltpu.MemorySpace.VMEM),
            pl.BlockSpec(memory_space=pltpu.MemorySpace.VMEM),
            pl.BlockSpec(memory_space=pltpu.MemorySpace.VMEM),
        ],
        out_specs=pl.BlockSpec((tn, Gp), lambda i: (i, 0)),
        compiler_params=pltpu.CompilerParams(
            dimension_semantics=("parallel",),                # megacore sharding on v7x
            vmem_limit_bytes=vmem_limit,
        ),
    )(x_in, we_t, wi_t, wd_t)

    # Trim only the padding that was actually added (no copy when aligned).
    if pad_rows and pad_cols:
        return y_p[:N, :G]
    if pad_rows:
        return y_p[:N]
    if pad_cols:
        return y_p[:, :G]
    return y_p


def _reference_forward_f32(x, w_enc, prior_mask, w_int, w_dec):
    """Pure-JAX f32 reference mirroring the PyTorch module forward (eval mode)."""
    we = w_enc * prior_mask.T
    h = jnp.maximum(x @ we.T, 0.0)
    z = jnp.maximum(h @ w_int.T, 0.0)
    y = jnp.maximum(z @ w_dec.T, 0.0)
    return y


def _reference_forward_bf16(x, we_t, wi_t, wd_t, G):
    """Pure-JAX reference matching the kernel numerics (bf16 ops, f32 accum)."""
    cdt = we_t.dtype
    Gp = we_t.shape[0]
    x_p = jnp.pad(x, ((0, 0), (0, Gp - G))).astype(cdt)
    h = jnp.maximum(jnp.dot(x_p, we_t, preferred_element_type=jnp.float32), 0.0)
    z = jnp.maximum(jnp.dot(h.astype(cdt), wi_t, preferred_element_type=jnp.float32), 0.0)
    y = jnp.maximum(jnp.dot(z.astype(cdt), wd_t, preferred_element_type=jnp.float32), 0.0)
    return y[:, :G].astype(x.dtype)


if __name__ == "__main__":
    # Small shapes: G genes, K TFs (hidden), N batch.  N=200 is not a multiple
    # of the tile so padding / slicing paths are exercised.
    N, G, K = 200, 128, 32

    key = jax.random.PRNGKey(0)
    k_x, k_mask, k_enc, k_int, k_dec, k_x2 = jax.random.split(key, 6)

    # Input gene expression (non-negative, like counts).
    x = jax.random.uniform(k_x, (N, G), dtype=jnp.float32)

    # Prior network mask [G x K]: genes -> TFs connections (deterministic).
    prior_mask = (jax.random.uniform(k_mask, (G, K)) < 0.3).astype(jnp.float32)

    # Deterministic parameter init (module __init__ shapes; synthetic values).
    w_enc = 0.1 * jax.random.normal(k_enc, (K, G), dtype=jnp.float32)  # Linear(G->K)
    w_int = 0.1 * jax.random.normal(k_int, (K, K), dtype=jnp.float32)  # Linear(K->K)
    w_dec = 0.1 * jax.random.normal(k_dec, (G, K), dtype=jnp.float32)  # Linear(K->G)

    # Hoisted once: mask-fold, transpose, pad to 128-multiples, bf16 cast.
    we_t, wi_t, wd_t = prepare_weights(w_enc, prior_mask, w_int, w_dec)

    out = tf_meta_autoencoder_forward(x, we_t, wi_t, wd_t)
    out = jax.block_until_ready(out)
    assert out.shape == (N, G)
    assert out.dtype == x.dtype

    # Tight check vs a matched-precision (bf16 operand, f32 accum) reference.
    ref_bf16 = _reference_forward_bf16(x, we_t, wi_t, wd_t, G)
    assert jnp.allclose(out, ref_bf16, atol=1e-3, rtol=1e-3)

    # Looser check vs the full-f32 module reference (bf16 weight drift).
    ref_f32 = _reference_forward_f32(x, w_enc, prior_mask, w_int, w_dec)
    assert jnp.allclose(out, ref_f32, atol=5e-2, rtol=5e-2)

    # Second call with an aligned batch (no padding, no output slice path).
    x2 = jax.random.uniform(k_x2, (256, G), dtype=jnp.float32)
    out2 = jax.block_until_ready(tf_meta_autoencoder_forward(x2, we_t, wi_t, wd_t))
    ref2 = _reference_forward_bf16(x2, we_t, wi_t, wd_t, G)
    assert out2.shape == (256, G)
    assert jnp.allclose(out2, ref2, atol=1e-3, rtol=1e-3)

    # TODO(synk): training-mode input/hidden dropout and the n_time_steps>0 /
    # return_tfa latent-replay paths of _forward are not implemented
    # (inference path only).
    print("KERNEL_OK")
</pallas_src>

<mosaic_0001>
module attributes {stable_mosaic.version = 11 : i64} {
  func.func @_tf_meta_ae_kernel(%arg0: i32, %arg1: memref<112x128xf32, #tpu.memory_space<vmem>>, %arg2: memref<128x128xbf16, #tpu.memory_space<vmem>>, %arg3: memref<128x128xbf16, #tpu.memory_space<vmem>>, %arg4: memref<128x128xbf16, #tpu.memory_space<vmem>>, %arg5: memref<112x128xf32, #tpu.memory_space<vmem>>) attributes {dimension_semantics = [#tpu.dimension_semantics<parallel>], iteration_bounds = array<i64: 2>, scalar_prefetch = 0 : i64, scratch_operands = 0 : i64, tpu.core_type = #tpu.core_type<tc>, window_params = [{transform_indices = @transform_0, window_bounds = array<i64: 112, 128>}, {pipeline_mode = #tpu.pipeline_mode<synchronous>, transform_indices = @transform_1, window_bounds = array<i64: 128, 128>}, {pipeline_mode = #tpu.pipeline_mode<synchronous>, transform_indices = @transform_2, window_bounds = array<i64: 128, 128>}, {pipeline_mode = #tpu.pipeline_mode<synchronous>, transform_indices = @transform_3, window_bounds = array<i64: 128, 128>}, {transform_indices = @transform_4, window_bounds = array<i64: 112, 128>}]} {
    %c0 = arith.constant 0 : index
    %c0_0 = arith.constant 0 : index
    %0 = vector.load %arg1[%c0, %c0_0] : memref<112x128xf32, #tpu.memory_space<vmem>>, vector<112x128xf32>
    %1 = arith.truncf %0 : vector<112x128xf32> to vector<112x128xbf16>
    %c0_1 = arith.constant 0 : index
    %c0_2 = arith.constant 0 : index
    %2 = vector.load %arg2[%c0_1, %c0_2] : memref<128x128xbf16, #tpu.memory_space<vmem>>, vector<128x128xbf16>
    %cst = arith.constant dense<0.000000e+00> : vector<112x128xf32>
    %3 = tpu.matmul %1, %2, %cst {dimension_numbers = #tpu.dot_dimension_numbers<[1], [0], [0], [1], [0, 0, 1, 1], [], []>} : vector<112x128xbf16>, vector<128x128xbf16>, vector<112x128xf32> -> vector<112x128xf32>
    %cst_3 = arith.constant 0.000000e+00 : f32
    %4 = vector.broadcast %cst_3 : f32 to vector<112x128xf32>
    %5 = arith.maximumf %3, %4 : vector<112x128xf32>
    %6 = arith.truncf %5 : vector<112x128xf32> to vector<112x128xbf16>
    %c0_4 = arith.constant 0 : index
    %c0_5 = arith.constant 0 : index
    %7 = vector.load %arg3[%c0_4, %c0_5] : memref<128x128xbf16, #tpu.memory_space<vmem>>, vector<128x128xbf16>
    %cst_6 = arith.constant dense<0.000000e+00> : vector<112x128xf32>
    %8 = tpu.matmul %6, %7, %cst_6 {dimension_numbers = #tpu.dot_dimension_numbers<[1], [0], [0], [1], [0, 0, 1, 1], [], []>} : vector<112x128xbf16>, vector<128x128xbf16>, vector<112x128xf32> -> vector<112x128xf32>
    %cst_7 = arith.constant 0.000000e+00 : f32
    %9 = vector.broadcast %cst_7 : f32 to vector<112x128xf32>
    %10 = arith.maximumf %8, %9 : vector<112x128xf32>
    %11 = arith.truncf %10 : vector<112x128xf32> to vector<112x128xbf16>
    %c0_8 = arith.constant 0 : index
    %c0_9 = arith.constant 0 : index
    %12 = vector.load %arg4[%c0_8, %c0_9] : memref<128x128xbf16, #tpu.memory_space<vmem>>, vector<128x128xbf16>
    %cst_10 = arith.constant dense<0.000000e+00> : vector<112x128xf32>
    %13 = tpu.matmul %11, %12, %cst_10 {dimension_numbers = #tpu.dot_dimension_numbers<[1], [0], [0], [1], [0, 0, 1, 1], [], []>} : vector<112x128xbf16>, vector<128x128xbf16>, vector<112x128xf32> -> vector<112x128xf32>
    %cst_11 = arith.constant 0.000000e+00 : f32
    %14 = vector.broadcast %cst_11 : f32 to vector<112x128xf32>
    %15 = arith.maximumf %13, %14 : vector<112x128xf32>
    %c0_12 = arith.constant 0 : index
    %c0_13 = arith.constant 0 : index
    %16 = vector.load %arg5[%c0_12, %c0_13] : memref<112x128xf32, #tpu.memory_space<vmem>>, vector<112x128xf32>
    tpu.vector_store %arg5[%c0_12, %c0_13], %15 {strides = array<i32>} : memref<112x128xf32, #tpu.memory_space<vmem>>, vector<112x128xf32>,
    return
  }
  func.func @transform_0(%arg0: i32) -> (i32, i32) {
    %c0_i32 = arith.constant 0 : i32
    %c0_i32_0 = arith.constant 0 : i32
    return %arg0, %c0_i32 : i32, i32
  }
  func.func @transform_1(%arg0: i32) -> (i32, i32) {
    %c0_i32 = arith.constant 0 : i32
    %c0_i32_0 = arith.constant 0 : i32
    %c0_i32_1 = arith.constant 0 : i32
    return %c0_i32, %c0_i32_0 : i32, i32
  }
  func.func @transform_2(%arg0: i32) -> (i32, i32) {
    %c0_i32 = arith.constant 0 : i32
    %c0_i32_0 = arith.constant 0 : i32
    %c0_i32_1 = arith.constant 0 : i32
    return %c0_i32, %c0_i32_0 : i32, i32
  }
  func.func @transform_3(%arg0: i32) -> (i32, i32) {
    %c0_i32 = arith.constant 0 : i32
    %c0_i32_0 = arith.constant 0 : i32
    %c0_i32_1 = arith.constant 0 : i32
    return %c0_i32, %c0_i32_0 : i32, i32
  }
  func.func @transform_4(%arg0: i32) -> (i32, i32) {
    %c0_i32 = arith.constant 0 : i32
    %c0_i32_0 = arith.constant 0 : i32
    return %arg0, %c0_i32 : i32, i32
  }
}

</mosaic_0001>

<bundles_post_ra>
// kernel: tf_meta_autoencoder_forward.1
= control target key start
LH: loop header
LB: loop body
LE: loop exit
PB: predicated region body
PF: predicated region fallthrough
CT: control target
= control target key end

     0   :  { %s1103_s15 = smov 0   ;;  %s1305_s0 = inlined_call_operand.vmem [shape: f32[224,128], index: 0, kind: input, shape index: {}]   ;;  %s1306_s1 = inlined_call_operand.vmem [shape: bf16[128,128], index: 1, kind: input, shape index: {}]   ;;  %s1307_s2 = inlined_call_operand.vmem [shape: bf16[128,128], index: 2, kind: input, shape index: {}]   ;;  %s1308_s3 = inlined_call_operand.vmem [shape: bf16[128,128], index: 3, kind: input, shape index: {}]   ;;  %s1309_s4 = inlined_call_operand.vmem [shape: f32[224,128], index: 4, kind: output, shape index: {}]  }
   0x1 LB: > { %s808_s16 = sadd.s32 4294967295, %s1074_s15   ;;  %p812_p0 = scmp.ge.s32.totalorder %s1074_s15, 1  ;;  %s1074_s15 = sphi %s1103_s15, %s14_s15  }
   0x2   : > { %p163_p1 = scmp.lt.s32.totalorder %s1074_s15, 3 }
   0x4   : > { %p164_p2 = pnand %p812_p0, %p163_p1 }
   0x5   : > { %v1044_v0 = vld [vmem:[%s1306_s1] sm:$0xff] (!%p164_p2)   ;;  %v1076_v1 = vmov (!%p164_p2), 0.0   ;;  %v1045_v2 = vld [vmem:[%s1306_s1 + $0x8] sm:$0xff] (!%p164_p2)   ;;  %vm1077_vm0 = vmmov (!%p164_p2), 0   ;;  %v1046_v3 = vld [vmem:[%s1306_s1 + $0x10] sm:$0xff] (!%p164_p2)   ;;  %s189_s23 = smul.u32 (!%p164_p2), 14, %s808_s16 }
   0x6   : > { %167 = sbr.rel (%p164_p2) target bundleno = 739 (0x2e3), region = 36  ;;  %886 = vmatprep.subr.bf16.mxu0 (!%p164_p2), %v1076_v1  ;;  %1018 = vmatprep.subr.bf16.mxu1 (!%p164_p2), %v1076_v1  ;;  %v1047_v4 = vld [vmem:[%s1306_s1 + $0x18] sm:$0xff] (!%p164_p2)   ;;  %v1048_v5 = vld [vmem:[%s1306_s1 + $0x20] sm:$0xff] (!%p164_p2)   ;;  %v1049_v6 = vld [vmem:[%s1306_s1 + $0x28] sm:$0xff] (!%p164_p2)  }
   0x7   : > { %887 = vmatpush3.bf16.msra.mxu0 (!%p164_p2), %v1044_v0  ;;  %1026 = vmatpush3.bf16.msra.mxu1 (!%p164_p2), %v1044_v0  ;;  %p190_p3 = scmp.lt.s32.totalorder (!%p164_p2), %s189_s23, 27  ;;  %v1050_v7 = vld [vmem:[%s1306_s1 + $0x30] sm:$0xff] (!%p164_p2)   ;;  %v1051_v8 = vld [vmem:[%s1306_s1 + $0x38] sm:$0xff] (!%p164_p2)   ;;  %v1052_v15 = vld [vmem:[%s1307_s2] sm:$0xff] (!%p164_p2)  }
   0x8   : > { %888 = vmatprep.subr.bf16.mxu0 (!%p164_p2), %v1076_v1  ;;  %902 = vmatprep.mubr.msk.bf16.mxu0 (!%p164_p2), %vm1077_vm0, %v1076_v1  ;;  %v1053_v20 = vld [vmem:[%s1307_s2 + $0x8] sm:$0xff] (!%p164_p2)   ;;  %v1054_v23 = vld [vmem:[%s1307_s2 + $0x10] sm:$0xff] (!%p164_p2)   ;;  %v1055_v28 = vld [vmem:[%s1307_s2 + $0x18] sm:$0xff] (!%p164_p2)  }
   0x9   : > { %1019 = vmatprep.subr.bf16.mxu1 (!%p164_p2), %v1076_v1  ;;  %918 = vmatprep.mubr.msk.bf16.mxu1 (!%p164_p2), %vm1077_vm0, %v1076_v1  ;;  %v1056_v31 = vld [vmem:[%s1307_s2 + $0x20] sm:$0xff] (!%p164_p2)   ;;  %v1057_v34 = vld [vmem:[%s1307_s2 + $0x28] sm:$0xff] (!%p164_p2)   ;;  %v1058_v36 = vld [vmem:[%s1307_s2 + $0x30] sm:$0xff] (!%p164_p2)  }
   0xa   : > { %v1059_v37 = vld [vmem:[%s1307_s2 + $0x38] sm:$0xff] (!%p164_p2)   ;;  %v1060_v38 = vld [vmem:[%s1308_s3] sm:$0xff] (!%p164_p2)   ;;  %v1061_v39 = vld [vmem:[%s1308_s3 + $0x8] sm:$0xff] (!%p164_p2)  }
   0xb   : > { %889 = vmatpush3.bf16.msra.mxu0 (!%p164_p2), %v1045_v2  ;;  %1027 = vmatpush3.bf16.msra.mxu1 (!%p164_p2), %v1045_v2  ;;  %v1062_v40 = vld [vmem:[%s1308_s3 + $0x10] sm:$0xff] (!%p164_p2)   ;;  %v1063_v41 = vld [vmem:[%s1308_s3 + $0x18] sm:$0xff] (!%p164_p2)   ;;  %v1064_v42 = vld [vmem:[%s1308_s3 + $0x20] sm:$0xff] (!%p164_p2)  }
   0xc   : > { %890 = vmatprep.subr.bf16.mxu0 (!%p164_p2), %v1076_v1  ;;  %1020 = vmatprep.subr.bf16.mxu1 (!%p164_p2), %v1076_v1  ;;  %v1065_v43 = vld [vmem:[%s1308_s3 + $0x28] sm:$0xff] (!%p164_p2)   ;;  %v1066_v44 = vld [vmem:[%s1308_s3 + $0x30] sm:$0xff] (!%p164_p2)  }
   0xd   : > { %s1311_s23 = smov (!%p190_p3, %s189_s23), 27 }
   0xe   : > { %s813_s30 = sshll.u32 %s1311_s23, 3 }
   0xf   : > { %891 = vmatpush3.bf16.msra.mxu0 %v1046_v3  ;;  %1028 = vmatpush3.bf16.msra.mxu1 %v1046_v3  ;;  %s1156_s9 = scalar_lea.vmem %s1305_s0, %s813_s30  ;;  %s1286_s25 = scalar_lea.vmem %s1309_s4, %s813_s30 }
  0x10   : > { %892 = vmatprep.subr.bf16.mxu0 %v1076_v1  ;;  %1021 = vmatprep.subr.bf16.mxu1 %v1076_v1  ;;  %v202_v9 = vld [vmem:[%s1156_s9] sm:$0xff]  ;;  %v203_v10 = vld [vmem:[%s1156_s9 + $0x8] sm:$0xff]  ;;  %v204_v16 = vld [vmem:[%s1156_s9 + $0x10] sm:$0xff] }
  0x11   : > { %v210_v11 = vld [vmem:[%s1156_s9 + $0x40] sm:$0xff]  ;;  %v211_v12 = vld [vmem:[%s1156_s9 + $0x48] sm:$0xff]  ;;  %v216_v13 = vpack.c.bf16 %v203_v10, %v202_v9  ;;  %v205_v17 = vld [vmem:[%s1156_s9 + $0x18] sm:$0xff] }
  0x12   : > { %v220_v14 = vpack.c.bf16 %v211_v12, %v210_v11  ;;  %v212_v18 = vld [vmem:[%s1156_s9 + $0x50] sm:$0xff]  ;;  %v213_v19 = vld [vmem:[%s1156_s9 + $0x58] sm:$0xff]  ;;  %v217_v21 = vpack.c.bf16 %v205_v17, %v204_v16  ;;  %v206_v24 = vld [vmem:[%s1156_s9 + $0x20] sm:$0xff] }
  0x13   : > { %893 = vmatpush3.bf16.msra.mxu0 %v1047_v4  ;;  %1029 = vmatpush3.bf16.msra.mxu1 %v1047_v4  ;;  %v221_v22 = vpack.c.bf16 %v213_v19, %v212_v18  ;;  %v207_v25 = vld [vmem:[%s1156_s9 + $0x28] sm:$0xff]  ;;  %v214_v26 = vld [vmem:[%s1156_s9 + $0x60] sm:$0xff]  ;;  %v208_v32 = vld [vmem:[%s1156_s9 + $0x30] sm:$0xff] }
  0x14   : > { %894 = vmatprep.subr.bf16.mxu0 %v1076_v1  ;;  %1022 = vmatprep.subr.bf16.mxu1 %v1076_v1  ;;  %v215_v27 = vld [vmem:[%s1156_s9 + $0x68] sm:$0xff]  ;;  %v218_v29 = vpack.c.bf16 %v207_v25, %v206_v24  ;;  %v209_v33 = vld [vmem:[%s1156_s9 + $0x38] sm:$0xff] }
  0x15   : > { %v222_v30 = vpack.c.bf16 %v215_v27, %v214_v26  ;;  %v219_v35 = vpack.c.bf16 %v209_v33, %v208_v32 }
  0x17   : > { %895 = vmatpush3.bf16.msra.mxu0 %v1048_v5  ;;  %1030 = vmatpush3.bf16.msra.mxu1 %v1048_v5 }
  0x18   : > { %896 = vmatprep.subr.bf16.mxu0 %v1076_v1  ;;  %1023 = vmatprep.subr.bf16.mxu1 %v1076_v1 }
  0x1b   : > { %897 = vmatpush3.bf16.msra.mxu0 %v1049_v6  ;;  %1031 = vmatpush3.bf16.msra.mxu1 %v1049_v6 }
  0x1c   : > { %898 = vmatprep.subr.bf16.mxu0 %v1076_v1  ;;  %1024 = vmatprep.subr.bf16.mxu1 %v1076_v1 }
  0x1f   : > { %899 = vmatpush3.bf16.msra.mxu0 %v1050_v7  ;;  %1032 = vmatpush3.bf16.msra.mxu1 %v1050_v7 }
  0x20   : > { %900 = vmatprep.subr.bf16.mxu0 %v1076_v1  ;;  %1025 = vmatprep.subr.bf16.mxu1 %v1076_v1 }
  0x23   : > { %901 = vmatpush3.bf16.msra.mxu0 %v1051_v8  ;;  %1033 = vmatpush3.bf16.msra.mxu1 %v1051_v8 }
  0x24   : > { %930 = vmatprep.subr.bf16.mxu1 %v1076_v1  ;;  %974 = vmatprep.subr.bf16.mxu0 %v1076_v1 }
  0x26   : > { %903 = vmatmul.mubr.bf16.vlgmr.msra.gmra.mrb[0].mxu0 %v216_v13  ;;  %919 = vmatmul.mubr.bf16.vlgmr.msra.gmra.mrb[0].mxu1 %v220_v14 }
  0x27   : > { %906 = vmatprep.mubr.msk.bf16.mxu0 %vm1077_vm0, %v1076_v1  ;;  %922 = vmatprep.mubr.msk.bf16.mxu1 %vm1077_vm0, %v1076_v1 }
  0x28   : > { %931 = vmatpush3.bf16.msra.mxu1 %v1052_v15  ;;  %975 = vmatpush3.bf16.msra.mxu0 %v1060_v38 }
  0x29   : > { %932 = vmatprep.subr.bf16.mxu1 %v1076_v1  ;;  %976 = vmatprep.subr.bf16.mxu0 %v1076_v1 }
  0x2c   : > { %933 = vmatpush3.bf16.msra.mxu1 %v1053_v20  ;;  %977 = vmatpush3.bf16.msra.mxu0 %v1061_v39 }
  0x2d   : > { %934 = vmatprep.subr.bf16.mxu1 %v1076_v1  ;;  %978 = vmatprep.subr.bf16.mxu0 %v1076_v1 }
  0x2e   : > { %907 = vmatmul.mubr.bf16.gmra.mrb[4].mxu0 %v217_v21  ;;  %923 = vmatmul.mubr.bf16.gmra.mrb[4].mxu1 %v221_v22 }
  0x2f   : > { %910 = vmatprep.mubr.msk.bf16.mxu0 %vm1077_vm0, %v1076_v1  ;;  %926 = vmatprep.mubr.msk.bf16.mxu1 %vm1077_vm0, %v1076_v1 }
  0x30   : > { %935 = vmatpush3.bf16.msra.mxu1 %v1054_v23  ;;  %979 = vmatpush3.bf16.msra.mxu0 %v1062_v40 }
  0x31   : > { %936 = vmatprep.subr.bf16.mxu1 %v1076_v1  ;;  %980 = vmatprep.subr.bf16.mxu0 %v1076_v1 }
  0x34   : > { %937 = vmatpush3.bf16.msra.mxu1 %v1055_v28  ;;  %981 = vmatpush3.bf16.msra.mxu0 %v1063_v41 }
  0x35   : > { %938 = vmatprep.subr.bf16.mxu1 %v1076_v1  ;;  %982 = vmatprep.subr.bf16.mxu0 %v1076_v1 }
  0x36   : > { %911 = vmatmul.mubr.bf16.gmra.mrb[8].mxu0 %v218_v29  ;;  %927 = vmatmul.mubr.bf16.gmra.mrb[8].mxu1 %v222_v30 }
  0x37   : > { %914 = vmatprep.mubr.msk.bf16.mxu0 %vm1077_vm0, %v1076_v1  ;;  %946 = vmatprep.mubr.msk.bf16.mxu1 %vm1077_vm0, %v1076_v1 }
  0x38   : > { %939 = vmatpush3.bf16.msra.mxu1 %v1056_v31  ;;  %983 = vmatpush3.bf16.msra.mxu0 %v1064_v42  ;;  %v1067_v31 = vld [vmem:[%s1308_s3 + $0x38] sm:$0xff]  }
  0x39   : > { %940 = vmatprep.subr.bf16.mxu1 %v1076_v1  ;;  %984 = vmatprep.subr.bf16.mxu0 %v1076_v1 }
  0x3c   : > { %941 = vmatpush3.bf16.msra.mxu1 %v1057_v34  ;;  %985 = vmatpush3.bf16.msra.mxu0 %v1065_v43 }
  0x3d   : > { %942 = vmatprep.subr.bf16.mxu1 %v1076_v1  ;;  %986 = vmatprep.subr.bf16.mxu0 %v1076_v1 }
  0x3e   : > { %915 = vmatmul.mubr.bf16.gmra.mrb[12].mxu0 %v219_v35 }
  0x3f   : > { %990 = vmatprep.mubr.msk.bf16.mxu0 %vm1077_vm0, %v1076_v1 }
  0x40   : > { %943 = vmatpush3.bf16.msra.mxu1 %v1058_v36  ;;  %987 = vmatpush3.bf16.msra.mxu0 %v1066_v44 }
  0x41   : > { %944 = vmatprep.subr.bf16.mxu1 %v1076_v1  ;;  %988 = vmatprep.subr.bf16.mxu0 %v1076_v1 }
  0x44   : > { %945 = vmatpush3.bf16.msra.mxu1 %v1059_v37  ;;  %989 = vmatpush3.bf16.msra.mxu0 %v1067_v31 }
  0xf9   : > { %v321_v45 = vpop.f32.mrb[0].mxu0  ;;  %v353_v46 = vpop.f32.mrb[0].mxu1 }
  0xfa   : > { %v904_v47 = vpop.f32.mrb[1].mxu0  ;;  %v384_v48 = vmax.f32 %v353_v46, 0.0  ;;  %v920_v49 = vpop.f32.mrb[1].mxu1  ;;  %v376_v52 = vmax.f32 %v321_v45, 0.0 }
  0xfb   : > { %v324_v50 = vpop.f32.mrb[2].mxu0  ;;  %v356_v51 = vpop.f32.mrb[2].mxu1 }
  0xfc   : > { %v377_v53 = vmax.f32 %v324_v50, 0.0  ;;  %v905_v54 = vpop.f32.mrb[3].mxu0  ;;  %v385_v55 = vmax.f32 %v356_v51, 0.0  ;;  %v921_v56 = vpop.f32.mrb[3].mxu1 }
  0xfe   : > { %v390_v57 = vpack.c.bf16 %v377_v53, %v376_v52  ;;  %v394_v58 = vpack.c.bf16 %v385_v55, %v384_v48 }
 0x100   : > { %947 = vmatmul.mubr.bf16.vlgmr.msra.gmra.mrb[12].mxu1 %v390_v57 }
 0x101   : > { %v329_v59 = vpop.f32.mrb[4].mxu0  ;;  %950 = vmatprep.mubr.msk.bf16.mxu1 %vm1077_vm0, %v1076_v1  ;;  %v361_v60 = vpop.f32.mrb[4].mxu1 }
 0x102   : > { %v908_v61 = vpop.f32.mrb[5].mxu0  ;;  %v386_v62 = vmax.f32 %v361_v60, 0.0  ;;  %v924_v63 = vpop.f32.mrb[5].mxu1  ;;  %v378_v3 = vmax.f32 %v329_v59, 0.0 }
 0x103   : > { %v332_v0 = vpop.f32.mrb[6].mxu0  ;;  %v364_v2 = vpop.f32.mrb[6].mxu1 }
 0x104   : > { %v379_v4 = vmax.f32 %v332_v0, 0.0  ;;  %v909_v5 = vpop.f32.mrb[7].mxu0  ;;  %v387_v6 = vmax.f32 %v364_v2, 0.0  ;;  %v925_v7 = vpop.f32.mrb[7].mxu1 }
 0x106   : > { %v391_v8 = vpack.c.bf16 %v379_v4, %v378_v3  ;;  %v395_v9 = vpack.c.bf16 %v387_v6, %v386_v62 }
 0x108   : > { %951 = vmatmul.mubr.bf16.gmra.mrb[16].mxu1 %v391_v8 }
 0x109   : > { %v337_v10 = vpop.f32.mrb[8].mxu0  ;;  %954 = vmatprep.mubr.msk.bf16.mxu1 %vm1077_vm0, %v1076_v1  ;;  %v369_v11 = vpop.f32.mrb[8].mxu1 }
 0x10a   : > { %v912_v12 = vpop.f32.mrb[9].mxu0  ;;  %v388_v13 = vmax.f32 %v369_v11, 0.0  ;;  %v928_v14 = vpop.f32.mrb[9].mxu1  ;;  %v380_v17 = vmax.f32 %v337_v10, 0.0 }
 0x10b   : > { %v340_v15 = vpop.f32.mrb[10].mxu0  ;;  %v372_v16 = vpop.f32.mrb[10].mxu1 }
 0x10c   : > { %v381_v18 = vmax.f32 %v340_v15, 0.0  ;;  %v913_v19 = vpop.f32.mrb[11].mxu0  ;;  %v389_v20 = vmax.f32 %v372_v16, 0.0  ;;  %v929_v21 = vpop.f32.mrb[11].mxu1 }
 0x10e   : > { %v392_v22 = vpack.c.bf16 %v381_v18, %v380_v17  ;;  %v396_v23 = vpack.c.bf16 %v389_v20, %v388_v13 }
 0x110   : > { %955 = vmatmul.mubr.bf16.gmra.mrb[20].mxu1 %v392_v22 }
 0x111   : > { %v345_v24 = vpop.f32.mrb[12].mxu0  ;;  %958 = vmatprep.mubr.msk.bf16.mxu1 %vm1077_vm0, %v1076_v1 }
 0x112   : > { %v916_v25 = vpop.f32.mrb[13].mxu0  ;;  %v382_v27 = vmax.f32 %v345_v24, 0.0 }
 0x113   : > { %v348_v26 = vpop.f32.mrb[14].mxu0 }
 0x114   : > { %v383_v28 = vmax.f32 %v348_v26, 0.0  ;;  %v917_v29 = vpop.f32.mrb[15].mxu0 }
 0x116   : > { %v393_v30 = vpack.c.bf16 %v383_v28, %v382_v27 }
 0x118   : > { %959 = vmatmul.mubr.bf16.gmra.mrb[24].mxu1 %v393_v30 }
 0x119   : > { %962 = vmatprep.mubr.msk.bf16.mxu1 %vm1077_vm0, %v1076_v1 }
 0x120   : > { %963 = vmatmul.mubr.bf16.gmra.mrb[28].mxu1 %v394_v58 }
 0x121   : > { %966 = vmatprep.mubr.msk.bf16.mxu1 %vm1077_vm0, %v1076_v1 }
 0x128   : > { %967 = vmatmul.mubr.bf16.gmra.mrb[32].mxu1 %v395_v9 }
 0x129   : > { %970 = vmatprep.mubr.msk.bf16.mxu1 %vm1077_vm0, %v1076_v1 }
 0x130   : > { %971 = vmatmul.mubr.bf16.gmra.mrb[36].mxu1 %v396_v23 }
 0x1d3   : > { %v495_v32 = vpop.f32.mrb[12].mxu1 }
 0x1d4   : > { %v948_v33 = vpop.f32.mrb[13].mxu1  ;;  %v550_v35 = vmax.f32 %v495_v32, 0.0 }
 0x1d5   : > { %v498_v34 = vpop.f32.mrb[14].mxu1 }
 0x1d6   : > { %v551_v36 = vmax.f32 %v498_v34, 0.0  ;;  %v949_v37 = vpop.f32.mrb[15].mxu1 }
 0x1d8   : > { %v564_v38 = vpack.c.bf16 %v551_v36, %v550_v35 }
 0x1da   : > { %991 = vmatmul.mubr.bf16.vlgmr.msra.gmra.mrb[16].mxu0 %v564_v38 }
 0x1db   : > { %v503_v39 = vpop.f32.mrb[16].mxu1  ;;  %994 = vmatprep.mubr.msk.bf16.mxu0 %vm1077_vm0, %v1076_v1 }
 0x1dc   : > { %v952_v40 = vpop.f32.mrb[17].mxu1  ;;  %v552_v42 = vmax.f32 %v503_v39, 0.0 }
 0x1dd   : > { %v506_v41 = vpop.f32.mrb[18].mxu1 }
 0x1de   : > { %v553_v43 = vmax.f32 %v506_v41, 0.0  ;;  %v953_v44 = vpop.f32.mrb[19].mxu1 }
 0x1e0   : > { %v565_v45 = vpack.c.bf16 %v553_v43, %v552_v42 }
 0x1e2   : > { %995 = vmatmul.mubr.bf16.gmra.mrb[20].mxu0 %v565_v45 }
 0x1e3   : > { %v511_v46 = vpop.f32.mrb[20].mxu1  ;;  %998 = vmatprep.mubr.msk.bf16.mxu0 %vm1077_vm0, %v1076_v1 }
 0x1e4   : > { %v956_v47 = vpop.f32.mrb[21].mxu1  ;;  %v554_v49 = vmax.f32 %v511_v46, 0.0 }
 0x1e5   : > { %v514_v48 = vpop.f32.mrb[22].mxu1 }
 0x1e6   : > { %v555_v50 = vmax.f32 %v514_v48, 0.0  ;;  %v957_v51 = vpop.f32.mrb[23].mxu1 }
 0x1e8   : > { %v566_v52 = vpack.c.bf16 %v555_v50, %v554_v49 }
 0x1ea   : > { %999 = vmatmul.mubr.bf16.gmra.mrb[24].mxu0 %v566_v52 }
 0x1eb   : > { %v519_v53 = vpop.f32.mrb[24].mxu1  ;;  %1002 = vmatprep.mubr.msk.bf16.mxu0 %vm1077_vm0, %v1076_v1 }
 0x1ec   : > { %v960_v54 = vpop.f32.mrb[25].mxu1  ;;  %v556_v56 = vmax.f32 %v519_v53, 0.0 }
 0x1ed   : > { %v522_v55 = vpop.f32.mrb[26].mxu1 }
 0x1ee   : > { %v557_v57 = vmax.f32 %v522_v55, 0.0  ;;  %v961_v58 = vpop.f32.mrb[27].mxu1 }
 0x1f0   : > { %v567_v59 = vpack.c.bf16 %v557_v57, %v556_v56 }
 0x1f2   : > { %1003 = vmatmul.mubr.bf16.gmra.mrb[28].mxu0 %v567_v59 }
 0x1f3   : > { %v527_v60 = vpop.f32.mrb[28].mxu1  ;;  %1006 = vmatprep.mubr.msk.bf16.mxu0 %vm1077_vm0, %v1076_v1 }
 0x1f4   : > { %v964_v61 = vpop.f32.mrb[29].mxu1  ;;  %v558_v63 = vmax.f32 %v527_v60, 0.0 }
 0x1f5   : > { %v530_v62 = vpop.f32.mrb[30].mxu1 }
 0x1f6   : > { %v559_v0 = vmax.f32 %v530_v62, 0.0  ;;  %v965_v2 = vpop.f32.mrb[31].mxu1 }
 0x1f8   : > { %v568_v3 = vpack.c.bf16 %v559_v0, %v558_v63 }
 0x1fa   : > { %1007 = vmatmul.mubr.bf16.gmra.mrb[32].mxu0 %v568_v3 }
 0x1fb   : > { %v535_v4 = vpop.f32.mrb[32].mxu1  ;;  %1010 = vmatprep.mubr.msk.bf16.mxu0 %vm1077_vm0, %v1076_v1 }
 0x1fc   : > { %v968_v5 = vpop.f32.mrb[33].mxu1  ;;  %v560_v7 = vmax.f32 %v535_v4, 0.0 }
 0x1fd   : > { %v538_v6 = vpop.f32.mrb[34].mxu1 }
 0x1fe   : > { %v561_v8 = vmax.f32 %v538_v6, 0.0  ;;  %v969_v9 = vpop.f32.mrb[35].mxu1 }
 0x200   : > { %v569_v10 = vpack.c.bf16 %v561_v8, %v560_v7 }
 0x202   : > { %1011 = vmatmul.mubr.bf16.gmra.mrb[36].mxu0 %v569_v10 }
 0x203   : > { %v543_v11 = vpop.f32.mrb[36].mxu1  ;;  %1014 = vmatprep.mubr.msk.bf16.mxu0 %vm1077_vm0, %v1076_v1 }
 0x204   : > { %v972_v12 = vpop.f32.mrb[37].mxu1  ;;  %v562_v14 = vmax.f32 %v543_v11, 0.0 }
 0x205   : > { %v546_v13 = vpop.f32.mrb[38].mxu1 }
 0x206   : > { %v563_v15 = vmax.f32 %v546_v13, 0.0  ;;  %v973_v16 = vpop.f32.mrb[39].mxu1 }
 0x208   : > { %v570_v17 = vpack.c.bf16 %v563_v15, %v562_v14 }
 0x20a   : > { %1015 = vmatmul.mubr.bf16.gmra.mrb[40].mxu0 %v570_v17 }
 0x2ad   : > { %v669_v18 = vpop.f32.mrb[16].mxu0 }
 0x2ae   : > { %v724_v19 = vmax.f32 %v669_v18, 0.0  ;;  %v992_v1 = vpop.f32.mrb[17].mxu0 }
 0x2af   : > { %v672_v20 = vpop.f32.mrb[18].mxu0 }
 0x2b0   : > { %738 = vst [vmem:[%s1286_s25] sm:$0xff] %v724_v19  ;;  %v725_v21 = vmax.f32 %v672_v20, 0.0  ;;  %v993_v22 = vpop.f32.mrb[19].mxu0 }
 0x2b2   : > { %739 = vst [vmem:[%s1286_s25 + $0x8] sm:$0xff] %v725_v21 }
 0x2b5   : > { %v677_v23 = vpop.f32.mrb[20].mxu0 }
 0x2b6   : > { %v726_v24 = vmax.f32 %v677_v23, 0.0  ;;  %v996_v25 = vpop.f32.mrb[21].mxu0 }
 0x2b7   : > { %v680_v26 = vpop.f32.mrb[22].mxu0 }
 0x2b8   : > { %740 = vst [vmem:[%s1286_s25 + $0x10] sm:$0xff] %v726_v24  ;;  %v727_v27 = vmax.f32 %v680_v26, 0.0  ;;  %v997_v28 = vpop.f32.mrb[23].mxu0 }
 0x2ba   : > { %741 = vst [vmem:[%s1286_s25 + $0x18] sm:$0xff] %v727_v27 }
 0x2bd   : > { %v685_v29 = vpop.f32.mrb[24].mxu0 }
 0x2be   : > { %v728_v30 = vmax.f32 %v685_v29, 0.0  ;;  %v1000_v31 = vpop.f32.mrb[25].mxu0 }
 0x2bf   : > { %v688_v32 = vpop.f32.mrb[26].mxu0 }
 0x2c0   : > { %742 = vst [vmem:[%s1286_s25 + $0x20] sm:$0xff] %v728_v30  ;;  %v729_v33 = vmax.f32 %v688_v32, 0.0  ;;  %v1001_v34 = vpop.f32.mrb[27].mxu0 }
 0x2c2   : > { %743 = vst [vmem:[%s1286_s25 + $0x28] sm:$0xff] %v729_v33 }
 0x2c5   : > { %v693_v35 = vpop.f32.mrb[28].mxu0 }
 0x2c6   : > { %v730_v36 = vmax.f32 %v693_v35, 0.0  ;;  %v1004_v37 = vpop.f32.mrb[29].mxu0 }
 0x2c7   : > { %v696_v38 = vpop.f32.mrb[30].mxu0 }
 0x2c8   : > { %744 = vst [vmem:[%s1286_s25 + $0x30] sm:$0xff] %v730_v36  ;;  %v731_v39 = vmax.f32 %v696_v38, 0.0  ;;  %v1005_v40 = vpop.f32.mrb[31].mxu0 }
 0x2ca   : > { %745 = vst [vmem:[%s1286_s25 + $0x38] sm:$0xff] %v731_v39 }
 0x2cd   : > { %v701_v41 = vpop.f32.mrb[32].mxu0 }
 0x2ce   : > { %v732_v42 = vmax.f32 %v701_v41, 0.0  ;;  %v1008_v43 = vpop.f32.mrb[33].mxu0 }
 0x2cf   : > { %v704_v44 = vpop.f32.mrb[34].mxu0 }
 0x2d0   : > { %746 = vst [vmem:[%s1286_s25 + $0x40] sm:$0xff] %v732_v42  ;;  %v733_v45 = vmax.f32 %v704_v44, 0.0  ;;  %v1009_v46 = vpop.f32.mrb[35].mxu0 }
 0x2d2   : > { %747 = vst [vmem:[%s1286_s25 + $0x48] sm:$0xff] %v733_v45 }
 0x2d5   : > { %v709_v47 = vpop.f32.mrb[36].mxu0 }
 0x2d6   : > { %v734_v48 = vmax.f32 %v709_v47, 0.0  ;;  %v1012_v49 = vpop.f32.mrb[37].mxu0 }
 0x2d7   : > { %v712_v50 = vpop.f32.mrb[38].mxu0 }
 0x2d8   : > { %748 = vst [vmem:[%s1286_s25 + $0x50] sm:$0xff] %v734_v48  ;;  %v735_v51 = vmax.f32 %v712_v50, 0.0  ;;  %v1013_v52 = vpop.f32.mrb[39].mxu0 }
 0x2da   : > { %749 = vst [vmem:[%s1286_s25 + $0x58] sm:$0xff] %v735_v51 }
 0x2dd   : > { %v717_v53 = vpop.f32.mrb[40].mxu0 }
 0x2de   : > { %v736_v54 = vmax.f32 %v717_v53, 0.0  ;;  %v1016_v55 = vpop.f32.mrb[41].mxu0 }
 0x2df   : > { %v720_v56 = vpop.f32.mrb[42].mxu0 }
 0x2e0   : > { %750 = vst [vmem:[%s1286_s25 + $0x60] sm:$0xff] %v736_v54  ;;  %v737_v57 = vmax.f32 %v720_v56, 0.0  ;;  %v1017_v58 = vpop.f32.mrb[43].mxu0 }
 0x2e2   : > { %751 = vst [vmem:[%s1286_s25 + $0x68] sm:$0xff] %v737_v57 }
 0x2e3 PF: > { %s14_s15 = sadd.s32 1, %s1074_s15  }
 0x2e4   : > { %p11_p4 = scmp.ge.s32.totalorder %s14_s15, 4  }
 0x2e6   :  { %13 = sbr.rel (!%p11_p4) target bundleno = 1 (0x1), region = 66 }

</bundles_post_ra>
